<compile_context>
chip_gen: v7x
topology: tpu7x:2x2x1
jax: 0.10.0
libtpu: 0.0.40
codegen_flags: <defaults>
</compile_context>

<pallas_src>
import functools

import jax
import jax.numpy as jnp
from jax import lax
from jax.experimental import pallas as pl
from jax.experimental.pallas import tpu as pltpu


def eiie_con_kernel(x_ref, w_ref, scal_ref, out_ref, *,
                    cin, cout, ksz, length, lout, batch):
    # x_ref   : (Cin, B*L)                 VMEM, x transposed so (batch, time)
    #                                       is the lane-dense axis
    # w_ref   : (Cout, K*Cin + 1 + Lout)   VMEM, packed [w1(k=0..K-1) | b1 | w2]
    # scal_ref: (4,)                       SMEM, [b2, w3, b3, para]
    # out_ref : (1, B+1)                   VMEM, lane-dense softmax output
    nvalid = batch * length - ksz + 1     # conv1 columns computed in B*L layout
    nb1 = batch + 1

    xf = x_ref[...]                       # (Cin, B*L)
    w = w_ref[...]                        # (Cout, K*Cin + 1 + Lout)

    # ---- conv1 (+ bias) + ReLU: K accumulating MXU dots over in-kernel
    #      shifted views of x (no wrapper-side im2col). Columns whose
    #      within-block offset >= Lout mix adjacent batches; they are zeroed
    #      by w2full below and never otherwise read.
    acc = jnp.dot(w[:, 0:cin], xf[:, 0:nvalid],
                  preferred_element_type=jnp.float32)
    for k in range(1, ksz):                            # static, K == 3
        acc = acc + jnp.dot(w[:, k * cin:(k + 1) * cin],
                            xf[:, k:k + nvalid],
                            preferred_element_type=jnp.float32)
    b1col = w[:, ksz * cin:ksz * cin + 1]              # (Cout, 1)
    yt = jnp.maximum(acc + b1col, 0.0)                 # (Cout, Nvalid)

    # ---- conv2 (kernel spans the whole valid map of each batch block):
    #      build the block-aligned w2 in-kernel by lane concatenation
    #      (zero pad kills the cross-batch columns), reduce channels first
    #      (sublane reduce), then one (1, Nvalid) x (Nvalid, B+1) dot against
    #      an iota-built block indicator -> lane-dense (1, B+1) scores.
    w2mat = w[:, ksz * cin + 1:ksz * cin + 1 + lout]   # (Cout, Lout)
    zpad = jnp.zeros((cout, ksz - 1), jnp.float32)
    parts = []
    for _ in range(batch - 1):
        parts.append(w2mat)
        parts.append(zpad)
    parts.append(w2mat)
    w2full = jnp.concatenate(parts, axis=1)            # (Cout, Nvalid)

    v = jnp.sum(yt * w2full, axis=0, keepdims=True)    # (1, Nvalid)

    j = lax.broadcasted_iota(jnp.int32, (nvalid, nb1), 0)
    blk = lax.broadcasted_iota(jnp.int32, (nvalid, nb1), 1) * length
    sel = jnp.where((j >= blk) & (j < blk + length), 1.0, 0.0)   # (Nvalid, B+1)
    z = jnp.dot(v, sel, preferred_element_type=jnp.float32)      # (1, B+1)

    # ---- ReLU + conv3 (1x1 conv == scalar affine); scalars come from SMEM.
    b2 = scal_ref[0]
    w3 = scal_ref[1]
    b3 = scal_ref[2]
    para = scal_ref[3]
    s = w3 * jnp.maximum(z + b2, 0.0) + b3              # (1, B+1)

    # ---- cat(scores, para): para occupies lane `batch`; lane-axis softmax.
    lane = lax.broadcasted_iota(jnp.int32, (1, nb1), 1)
    logits = jnp.where(lane < batch, s, para)
    m = jnp.max(logits, axis=1, keepdims=True)
    e = jnp.exp(logits - m)
    out_ref[...] = e * pl.reciprocal(jnp.sum(e, axis=1, keepdims=True),
                                     approx=True)


@jax.jit
def eiie_con_forward(x, w1, b1, w2, b2, w3, b3, para):
    """x: (B, L, C_in); params in PyTorch Conv1d shapes. Returns (B+1,) softmax."""
    B, L, Cin = x.shape
    Cout, _, K = w1.shape
    Lout = L - K + 1
    nvalid = B * L - K + 1

    # --- minimal wrapper-side layout glue (one transposed copy of x) --------
    # xt[c, b*L + l] = x[b, l, c]
    xt = jnp.transpose(x.astype(jnp.float32), (2, 0, 1)).reshape(Cin, B * L)

    # single packed weight slab: [ w1 as K (Cout,Cin) slabs | b1 | w2 ]
    w1m = jnp.transpose(w1, (0, 2, 1)).reshape(Cout, K * Cin)   # [o, k*Cin + c]
    wpack = jnp.concatenate(
        [w1m, b1.reshape(Cout, 1), w2[0]], axis=1).astype(jnp.float32)

    # scalar params as one SMEM vector: [b2, w3, b3, para]
    scal = jnp.stack([b2.reshape(()), w3.reshape(()),
                      b3.reshape(()), para.reshape(())]).astype(jnp.float32)

    vmem = pl.BlockSpec(memory_space=pltpu.MemorySpace.VMEM)
    smem = pl.BlockSpec(memory_space=pltpu.MemorySpace.SMEM)

    cost = pl.CostEstimate(
        flops=2 * Cout * Cin * nvalid * K          # conv1 dots
              + 3 * Cout * nvalid                  # conv2 weighting + reduce
              + 2 * nvalid * (B + 1)               # block-indicator dot
              + 8 * (B + 1),                       # affine + softmax
        transcendentals=(B + 1) + 1,
        bytes_accessed=4 * (xt.size + wpack.size + scal.size + (B + 1)),
    )

    # TODO(synk): for non-toy B/L add a grid over batch blocks with
    # dimension_semantics=("parallel",) (lights up v7x's 2nd TensorCore),
    # lane-padded per-step output slabs, a tiny softmax epilogue (it couples
    # all batches), bf16 x/weights on v6e/v7x (keep f32 accumulation), and
    # vmem_limit_bytes for v5e's 16 MiB scoped default.
    out = pl.pallas_call(
        functools.partial(eiie_con_kernel, cin=Cin, cout=Cout, ksz=K,
                          length=L, lout=Lout, batch=B),
        out_shape=jax.ShapeDtypeStruct((1, B + 1), jnp.float32),
        in_specs=[vmem, vmem, smem],
        out_specs=vmem,
        cost_estimate=cost,
    )(xt, wpack, scal)
    return out.reshape(-1)


def ref_forward(x, w1, b1, w2, b2, w3, b3, para):
    """Pure-JAX reference mirroring the PyTorch module."""
    dn = ("NCH", "OIH", "NCH")
    xt = jnp.transpose(x, (0, 2, 1))                                   # (B, Cin, L)
    y = lax.conv_general_dilated(xt, w1, (1,), "VALID",
                                 dimension_numbers=dn) + b1[None, :, None]
    y = jnp.maximum(y, 0.0)
    z = lax.conv_general_dilated(y, w2, (1,), "VALID",
                                 dimension_numbers=dn) + b2[None, :, None]
    z = jnp.maximum(z, 0.0)
    o = lax.conv_general_dilated(z, w3, (1,), "VALID",
                                 dimension_numbers=dn) + b3[None, :, None]
    logits = jnp.concatenate([o.reshape(-1), para], axis=0)
    return jax.nn.softmax(logits, axis=0)


if __name__ == "__main__":
    B, L, Cin, Cout, K = 2, 16, 4, 8, 3   # in_channels=4, out_channels=8, length=16

    key = jax.random.PRNGKey(0)
    ks = jax.random.split(key, 7)
    # Deterministic synthetic parameters (PyTorch Conv1d weight shapes).
    w1 = 0.1 * jax.random.normal(ks[0], (Cout, Cin, K), jnp.float32)
    b1 = 0.1 * jax.random.normal(ks[1], (Cout,), jnp.float32)
    w2 = 0.1 * jax.random.normal(ks[2], (1, Cout, L - K + 1), jnp.float32)
    b2 = 0.1 * jax.random.normal(ks[3], (1,), jnp.float32)
    w3 = 0.1 * jax.random.normal(ks[4], (1, 1, 1), jnp.float32)
    b3 = 0.1 * jax.random.normal(ks[5], (1,), jnp.float32)
    para = jnp.ones((1,), jnp.float32)    # torch.nn.Parameter(torch.ones(1))

    x = jax.random.normal(ks[6], (B, L, Cin), jnp.float32)

    out = jax.block_until_ready(eiie_con_forward(x, w1, b1, w2, b2, w3, b3, para))
    ref = ref_forward(x, w1, b1, w2, b2, w3, b3, para)

    assert out.shape == (B + 1,), out.shape
    # tolerance relaxed from 1e-5: approx (EUP) reciprocal + f32 sum reordering.
    assert jnp.allclose(out, ref, atol=2e-3, rtol=2e-3), (out, ref)
    print("KERNEL_OK")
</pallas_src>

<mosaic_0001>
module attributes {stable_mosaic.version = 11 : i64} {
  func.func @eiie_con_kernel(%arg0: memref<4x32xf32, #tpu.memory_space<vmem>>, %arg1: memref<8x27xf32, #tpu.memory_space<vmem>>, %arg2: memref<4xf32, #tpu.memory_space<smem>>, %arg3: memref<1x3xf32, #tpu.memory_space<vmem>>) attributes {dimension_semantics = [], scalar_prefetch = 0 : i64, scratch_operands = 0 : i64, tpu.core_type = #tpu.core_type<tc>} {
    %c0 = arith.constant 0 : index
    %c0_0 = arith.constant 0 : index
    %0 = vector.load %arg0[%c0, %c0_0] : memref<4x32xf32, #tpu.memory_space<vmem>>, vector<4x32xf32>
    %c0_1 = arith.constant 0 : index
    %c0_2 = arith.constant 0 : index
    %1 = vector.load %arg1[%c0_1, %c0_2] : memref<8x27xf32, #tpu.memory_space<vmem>>, vector<8x27xf32>
    %2 = vector.extract_strided_slice %1 {offsets = [0, 0], sizes = [8, 4], strides = [1, 1]} : vector<8x27xf32> to vector<8x4xf32>
    %3 = vector.extract_strided_slice %0 {offsets = [0, 0], sizes = [4, 30], strides = [1, 1]} : vector<4x32xf32> to vector<4x30xf32>
    %cst = arith.constant dense<0.000000e+00> : vector<8x30xf32>
    %4 = tpu.matmul %2, %3, %cst {dimension_numbers = #tpu.dot_dimension_numbers<[1], [0], [0], [1], [0, 0, 1, 1], [], []>} : vector<8x4xf32>, vector<4x30xf32>, vector<8x30xf32> -> vector<8x30xf32>
    %5 = vector.extract_strided_slice %1 {offsets = [0, 4], sizes = [8, 4], strides = [1, 1]} : vector<8x27xf32> to vector<8x4xf32>
    %6 = vector.extract_strided_slice %0 {offsets = [0, 1], sizes = [4, 30], strides = [1, 1]} : vector<4x32xf32> to vector<4x30xf32>
    %cst_3 = arith.constant dense<0.000000e+00> : vector<8x30xf32>
    %7 = tpu.matmul %5, %6, %cst_3 {dimension_numbers = #tpu.dot_dimension_numbers<[1], [0], [0], [1], [0, 0, 1, 1], [], []>} : vector<8x4xf32>, vector<4x30xf32>, vector<8x30xf32> -> vector<8x30xf32>
    %8 = arith.addf %4, %7 : vector<8x30xf32>
    %9 = vector.extract_strided_slice %1 {offsets = [0, 8], sizes = [8, 4], strides = [1, 1]} : vector<8x27xf32> to vector<8x4xf32>
    %10 = vector.extract_strided_slice %0 {offsets = [0, 2], sizes = [4, 30], strides = [1, 1]} : vector<4x32xf32> to vector<4x30xf32>
    %cst_4 = arith.constant dense<0.000000e+00> : vector<8x30xf32>
    %11 = tpu.matmul %9, %10, %cst_4 {dimension_numbers = #tpu.dot_dimension_numbers<[1], [0], [0], [1], [0, 0, 1, 1], [], []>} : vector<8x4xf32>, vector<4x30xf32>, vector<8x30xf32> -> vector<8x30xf32>
    %12 = arith.addf %8, %11 : vector<8x30xf32>
    %13 = vector.extract_strided_slice %1 {offsets = [0, 12], sizes = [8, 1], strides = [1, 1]} : vector<8x27xf32> to vector<8x1xf32>
    %14 = vector.broadcast %13 : vector<8x1xf32> to vector<8x30xf32>
    %15 = arith.addf %12, %14 : vector<8x30xf32>
    %cst_5 = arith.constant 0.000000e+00 : f32
    %16 = vector.broadcast %cst_5 : f32 to vector<8x30xf32>
    %17 = arith.maximumf %15, %16 : vector<8x30xf32>
    %18 = vector.extract_strided_slice %1 {offsets = [0, 13], sizes = [8, 14], strides = [1, 1]} : vector<8x27xf32> to vector<8x14xf32>
    %cst_6 = arith.constant 0.000000e+00 : f32
    %19 = vector.broadcast %cst_6 : f32 to vector<8x2xf32>
    %20 = tpu.concatenate %18, %19, %18 in 1 : vector<8x14xf32>, vector<8x2xf32>, vector<8x14xf32> -> vector<8x30xf32>
    %21 = arith.mulf %17, %20 : vector<8x30xf32>
    %cst_7 = arith.constant dense<0.000000e+00> : vector<30xf32>
    %22 = vector.multi_reduction <add>, %21, %cst_7 [0] : vector<8x30xf32> to vector<30xf32>
    %23 = vector.shape_cast %22 : vector<30xf32> to vector<1x30xf32>
    %24 = tpu.iota {dimensions = array<i32: 0>} : vector<30x3xi32>
    %25 = tpu.iota {dimensions = array<i32: 1>} : vector<30x3xi32>
    %c16_i32 = arith.constant 16 : i32
    %26 = vector.broadcast %c16_i32 : i32 to vector<30x3xi32>
    %27 = arith.muli %25, %26 : vector<30x3xi32>
    %28 = arith.cmpi sge, %24, %27 : vector<30x3xi32>
    %c16_i32_8 = arith.constant 16 : i32
    %29 = vector.broadcast %c16_i32_8 : i32 to vector<30x3xi32>
    %30 = arith.addi %27, %29 : vector<30x3xi32>
    %31 = arith.cmpi slt, %24, %30 : vector<30x3xi32>
    %32 = arith.andi %28, %31 : vector<30x3xi1>
    %cst_9 = arith.constant 1.000000e+00 : f32
    %cst_10 = arith.constant 0.000000e+00 : f32
    %33 = vector.broadcast %cst_9 : f32 to vector<30x3xf32>
    %34 = vector.broadcast %cst_10 : f32 to vector<30x3xf32>
    %35 = arith.select %32, %33, %34 : vector<30x3xi1>, vector<30x3xf32>
    %cst_11 = arith.constant dense<0.000000e+00> : vector<1x3xf32>
    %36 = tpu.matmul %23, %35, %cst_11 {dimension_numbers = #tpu.dot_dimension_numbers<[1], [0], [0], [1], [0, 0, 1, 1], [], []>} : vector<1x30xf32>, vector<30x3xf32>, vector<1x3xf32> -> vector<1x3xf32>
    %c0_12 = arith.constant 0 : index
    %37 = memref.load %arg2[%c0_12] : memref<4xf32, #tpu.memory_space<smem>>
    %c1 = arith.constant 1 : index
    %38 = memref.load %arg2[%c1] : memref<4xf32, #tpu.memory_space<smem>>
    %c2 = arith.constant 2 : index
    %39 = memref.load %arg2[%c2] : memref<4xf32, #tpu.memory_space<smem>>
    %c3 = arith.constant 3 : index
    %40 = memref.load %arg2[%c3] : memref<4xf32, #tpu.memory_space<smem>>
    %41 = vector.broadcast %37 : f32 to vector<1x3xf32>
    %42 = arith.addf %36, %41 : vector<1x3xf32>
    %cst_13 = arith.constant 0.000000e+00 : f32
    %43 = vector.broadcast %cst_13 : f32 to vector<1x3xf32>
    %44 = arith.maximumf %42, %43 : vector<1x3xf32>
    %45 = vector.broadcast %38 : f32 to vector<1x3xf32>
    %46 = arith.mulf %45, %44 : vector<1x3xf32>
    %47 = vector.broadcast %39 : f32 to vector<1x3xf32>
    %48 = arith.addf %46, %47 : vector<1x3xf32>
    %49 = tpu.iota {dimensions = array<i32: 1>} : vector<1x3xi32>
    %c2_i32 = arith.constant 2 : i32
    %50 = vector.broadcast %c2_i32 : i32 to vector<1x3xi32>
    %51 = arith.cmpi slt, %49, %50 : vector<1x3xi32>
    %52 = vector.broadcast %40 : f32 to vector<1x3xf32>
    %53 = arith.select %51, %48, %52 : vector<1x3xi1>, vector<1x3xf32>
    %cst_14 = arith.constant dense<0xFF800000> : vector<1xf32>
    %54 = vector.multi_reduction <maximumf>, %53, %cst_14 [1] : vector<1x3xf32> to vector<1xf32>
    %55 = vector.shape_cast %54 : vector<1xf32> to vector<1x1xf32>
    %56 = vector.broadcast %55 : vector<1x1xf32> to vector<1x3xf32>
    %57 = arith.subf %53, %56 : vector<1x3xf32>
    %58 = math.exp %57 : vector<1x3xf32>
    %cst_15 = arith.constant dense<0.000000e+00> : vector<1xf32>
    %59 = vector.multi_reduction <add>, %58, %cst_15 [1] : vector<1x3xf32> to vector<1xf32>
    %60 = vector.shape_cast %59 : vector<1xf32> to vector<1x1xf32>
    %61 = tpu.reciprocal %60 {approx = true} : vector<1x1xf32> -> vector<1x1xf32>
    %62 = vector.broadcast %61 : vector<1x1xf32> to vector<1x3xf32>
    %63 = arith.mulf %58, %62 : vector<1x3xf32>
    %c0_16 = arith.constant 0 : index
    %c0_17 = arith.constant 0 : index
    %64 = vector.load %arg3[%c0_16, %c0_17] : memref<1x3xf32, #tpu.memory_space<vmem>>, vector<1x3xf32>
    tpu.vector_store %arg3[%c0_16, %c0_17], %63 {strides = array<i32>} : memref<1x3xf32, #tpu.memory_space<vmem>>, vector<1x3xf32>,
    return
  }
}

</mosaic_0001>

<bundles_post_ra>
// kernel: eiie_con_forward.1
= control target key start
LH: loop header
LB: loop body
LE: loop exit
PB: predicated region body
PF: predicated region fallthrough
CT: control target
= control target key end

     0   :  { %8 = vsyncpa [#allocation4], 0  ;;  %s620_s0 = inlined_call_operand.vmem [shape: f32[4,32], index: 0, kind: input, shape index: {}]   ;;  %s621_s1 = inlined_call_operand.vmem [shape: f32[8,27], index: 1, kind: input, shape index: {}]   ;;  %s622_s2 = inlined_call_operand.vmem [shape: f32[4], index: 2, kind: input, shape index: {}]   ;;  %s623_s3 = inlined_call_operand.hbm [shape: f32[1,3], index: 3, kind: output, shape index: {}]  }
   0x1   :  { %9 = vsyncpa [#allocation3], 0  ;;  %s20_s14 = sshll.u32 %s622_s2, 4  ;;  %s21_s14 = int_to_ptr.vmem [resolvable:$true] %s20_s14 }
   0x2   :  { %s510_s15 = scalar_lea.vmem %s21_s14, 16  ;;  %p515_p1 = scmp.lt.s32.totalorder %s21_s14, %s21_s14 }
   0x3   :  { %p511_p0 = scmp.ne.s32.totalorder %s21_s14, %s510_s15  ;;  %p516_p2 = scmp.lt.s32.totalorder %s510_s15, %s510_s15 }
   0x5   :  { %p517_p3 = por %p516_p2, %p515_p1 }
   0x7   :  { %p518_p4 = pnand %p517_p3, %p511_p0 }
   0x9   :  { %521 = shalt.err (!%p518_p4)
}
   0xa   :  { %s548_s16 = smov [#allocation2]  }
   0xb   :  { %23 = dma.vmem_to_smem %s21_s14, 16, %s548_s16, [#allocation4]  }
   0xc   :  { %544 = dma.done.wait [#allocation4], 16  }
   0xd   :  { %545 = vsyncadd [#allocation4], 4294967280 }
   0xe   :  { %27 = sfence }
   0xf   :  { %v28_v0 = vld [vmem:[%s620_s0] sm:$0xf]  ;;  %s549_s19 = smov 127   ;;  %s550_s2 = smov 126   ;;  %v551_v2 = vmov 0.0   ;;  %vm39_vm0 = vcmask 1043456   ;;  %v290_v8 = vlaneseq }
  0x10   :  { %34 = vrot.lane.b32.xlu0 %v28_v0, %s549_s19  ;;  %188 = vrot.lane.b32.xlu1 %v28_v0, %s550_s2  ;;  %v29_v1 = vld [vmem:[%s621_s1] sm:$0xff]  ;;  %vm552_vm1 = vmmov 0   ;;  %vm36_vm2 = vcmask 31744   ;;  %v553_v3 = vmov 12   ;;  %s554_s0 = smov 124   ;;  %s555_s22 = smov 120  }
  0x11   :  { %458 = vmatprep.subr.mxu0 %v551_v2  ;;  %463 = vmatprep.subr.mxu1 %v551_v2  ;;  %s556_s1 = smov 115   ;;  %s557_s23 = smov 3   ;;  %v601_v9 = vand.u32 127, %v290_v8  ;;  %v291_v10 = vshrl.u32 %v290_v8, 7  ;;  %v558_v17 = vmov 0.0|0.0   ;;  %v560_v21 = vmov 1.0  }
  0x12   :  { %460 = vmatprep.mubr.msk.f32.mxu0 %vm552_vm1, %v551_v2  ;;  %465 = vmatprep.mubr.msk.f32.mxu1 %vm552_vm1, %v551_v2  ;;  %v559_v19 = vmov 1.0|1.0   ;;  %s315_s24 = sld [smem:[#allocation2]]  ;;  %s439_s25 = sld [smem:[#allocation2 + $0x1]] }
  0x13   :  { %464 = vmatpush3.msk.msra.mxu1 %vm39_vm0, %v28_v0  ;;  %505 = vset.pattern.permute.xlu0 %v553_v3  ;;  %v297_v11 = vmul.u32 16, %v601_v9  ;;  %v292_v14 = vadd.s32 8, %v291_v10  ;;  %v294_v16 = vadd.s32 24, %v291_v10  ;;  %v293_v18 = vadd.s32 16, %v291_v10  ;;  %s440_s26 = sld [smem:[#allocation2 + $0x2]]  ;;  %s441_s27 = sld [smem:[#allocation2 + $0x3]] }
  0x14   :  { %31 = vrot.lane.b32.xlu0 %v29_v1, %s554_s0  ;;  %186 = vrot.lane.b32.xlu1 %v29_v1, %s555_s22  ;;  %s561_s28 = smov [#allocation5]  }
  0x15   :  { %466 = vmatmul.mubr.msk.f32.vlgmr.msra.gmra.mrb[0].mxu1 %vm36_vm2, %v29_v1  ;;  %v302_v15 = vadd.s32 16, %v297_v11  ;;  %vm298_vm3 = vcmp.ge.s32.totalorder %v291_v10, %v297_v11  ;;  %vm299_vm4 = vcmp.ge.s32.totalorder %v292_v14, %v297_v11  ;;  %484 = vmatprep.subr.bf16.mxu1 %v558_v17  ;;  %vm301_vm10 = vcmp.ge.s32.totalorder %v294_v16, %v297_v11  ;;  %s424_s29 = sshll.u32 %s561_s28, 4  ;;  %s425_s29 = int_to_ptr.vmem [resolvable:$true] %s424_s29 }
  0x16   :  { %481 = vmatprep.mubr.msk.f32.mxu1 %vm552_vm1, %v551_v2  ;;  %vm300_vm12 = vcmp.ge.s32.totalorder %v293_v18, %v297_v11  ;;  %s522_s30 = scalar_lea.vmem %s425_s29, 16  ;;  %s526_s4 = scalar_lea.vmem %s425_s29, 32 }
  0x17   :  { %vm303_vm5 = vcmp.lt.s32.totalorder %v291_v10, %v302_v15  ;;  %vm304_vm6 = vcmp.lt.s32.totalorder %v292_v14, %v302_v15  ;;  %vm306_vm11 = vcmp.lt.s32.totalorder %v294_v16, %v302_v15  ;;  %vm305_vm13 = vcmp.lt.s32.totalorder %v293_v18, %v302_v15  ;;  %p523_p5 = scmp.ne.s32.totalorder %s425_s29, %s522_s30  ;;  %p527_p6 = scmp.lt.s32.totalorder %s425_s29, %s425_s29 }
  0x18   :  { %266 = vperm.xlu0 %505, %v29_v1   ;;  %271 = vrot.lane.b32.xlu1 %v29_v1, %s556_s1  ;;  %vm307_vm7 = vmand %vm298_vm3, %vm303_vm5  ;;  %vm279_vm3 = vcmask 130048   ;;  %v319_v44 = vstv %s315_s24  ;;  %v398_v48 = vstv %s439_s25  ;;  %vm402_vm5 = vcmp.lt.s32.totalorder %v601_v9, 2  ;;  %p528_p7 = scmp.lt.s32.totalorder %s526_s4, %s522_s30 }
  0x19   :  { %vm308_vm8 = vmand %vm299_vm4, %vm304_vm6  ;;  %vm282_vm4 = vcmask 244736   ;;  %v400_v50 = vstv %s440_s26  ;;  %v403_v52 = vstv %s441_s27  ;;  %vm405_vm6 = vcmask 16384  }
  0x1a   :  { %vm485_vm9 = vmpackc.low %vm308_vm8, %vm307_vm7  ;;  %p529_p8 = por %p528_p7, %p527_p6 }
  0x1b   :  { %486 = vmatpush3.bf16.msk.msra.mxu1 %vm485_vm9, %v559_v19  ;;  %vm310_vm14 = vmand %vm301_vm10, %vm306_vm11 }
  0x1c   :  { %274 = vrot.lane.b32.xlu1 %v29_v1, %s557_s23  ;;  %487 = vmatprep.subr.bf16.mxu1 %v558_v17  ;;  %vm309_vm15 = vmand %vm300_vm12, %vm305_vm13  ;;  %v314_v20 = vsel %vm310_vm14, 1.0, %v551_v2  ;;  %p530_p9 = pnand %p529_p8, %p523_p5 }
  0x1d   :  { %v488_v22 = vpack.c.bf16 %v314_v20, %v560_v21 }
  0x82   :  { %v35_v4 = vpop.permute.xlu0 %34  ;;  %v189_v5 = vpop.permute.xlu1 %188 }
  0x83   :  { %459 = vmatpush3.msk.msra.mxu0 %vm39_vm0, %v35_v4 }
  0x84   :  { %468 = vmatprep.subr.mxu0 %v551_v2 }
  0x86   :  { %v32_v6 = vpop.permute.xlu0 %31  ;;  %v187_v7 = vpop.permute.xlu1 %186 }
  0x87   :  { %461 = vmatmul.mubr.msk.f32.vlgmr.msra.gmra.mrb[0].mxu0 %vm36_vm2, %v32_v6 }
  0x88   :  { %469 = vmatpush3.msk.msra.mxu0 %vm39_vm0, %v189_v5  ;;  %470 = vmatprep.mubr.msk.f32.mxu0 %vm552_vm1, %v551_v2  ;;  %vm323_vm0 = vcmask 1045504  }
  0x89   :  { %vm489_vm1 = vmpackc.low %vm323_vm0, %vm309_vm15 }
  0x8a   :  { %490 = vmatpush3.bf16.msk.msra.mxu1 %vm489_vm1, %v488_v22  ;;  %v272_v26 = vpop.permute.xlu1 %271 }
  0x8b   :  { %471 = vmatmul.mubr.msk.f32.vlgmr.msra.gmra.mrb[2].mxu0 %vm36_vm2, %v187_v7  ;;  %vm277_vm2 = vcmask 113664  }
  0x8c   :  { %v278_v31 = vsel %vm277_vm2, %v272_v26, 0.0 }
  0x8e   :  { %v275_v32 = vpop.permute.xlu1 %274 }
  0x8f   :  { %v280_v35 = vsel %vm279_vm3, %v278_v31, %v275_v32 }
  0x97   :  { %v267_v28 = vpop.permute.xlu0 %266 }
  0xe8   :  { %v182_v12 = vpop.f32.mrb[0].mxu1 }
  0xe9   :  { %v467_v13 = vpop.f32.mrb[1].mxu1 }
 0x15a   :  { %v108_v23 = vpop.f32.mrb[0].mxu0 }
 0x15b   :  { %v183_v24 = vadd.f32 %v182_v12, %v108_v23  ;;  %v462_v25 = vpop.f32.mrb[1].mxu0 }
 0x15e   :  { %v260_v27 = vpop.f32.mrb[2].mxu0 }
 0x15f   :  { %v264_v29 = vadd.f32 %v260_v27, %v183_v24  ;;  %v472_v30 = vpop.f32.mrb[3].mxu0 }
 0x161   :  { %v269_v33 = vadd.f32 %v267_v28, %v264_v29 }
 0x163   :  { %v270_v34 = vmax.f32 %v269_v33, 0.0 }
 0x165   :  { %v281_v36 = vmul.f32 %v280_v35, %v270_v34 }
 0x167   :  { %v283_v37 = vsel %vm282_vm4, %v281_v36, 0.0 }
 0x168   :  { %v284_v38 = vrot.slane %v283_v37, 4 }
 0x16a   :  { %v285_v39 = vadd.f32 %v284_v38, %v283_v37 }
 0x16c   :  { %v286_v40 = vrot.slane %v285_v39, 2 }
 0x16e   :  { %v287_v41 = vadd.f32 %v286_v40, %v285_v39 }
 0x170   :  { %v288_v42 = vrot.slane %v287_v41, 1 }
 0x172   :  { %v289_v43 = vadd.f32 %v288_v42, %v287_v41 }
 0x174   :  { %482 = vmatmul.mubr.msk.f32.vlgmr.msra.gmra.mrb[2].mxu1 %vm282_vm4, %v289_v43 }
 0x247   :  { %v393_v45 = vpop.f32.mrb[2].mxu1 }
 0x248   :  { %v394_v46 = vadd.f32 %v393_v45, %v319_v44  ;;  %v483_v47 = vpop.f32.mrb[3].mxu1 }
 0x24a   :  { %v397_v49 = vmax.f32 %v394_v46, 0.0 }
 0x24c   :  { %v399_v51 = vmul.f32 %v398_v48, %v397_v49 }
 0x24e   :  { %v401_v53 = vadd.f32 %v400_v50, %v399_v51 }
 0x250   :  { %v404_v54 = vsel %vm402_vm5, %v401_v53, %v403_v52 }
 0x251   :  { %v406_v55 = vsel %vm405_vm6, %v404_v54, -inf }
 0x252   :  { %407 = vmax.xlane.f32.xlu0 %v406_v55 }
 0x2df   :  { %v408_v56 = vpop.xlane.xlu0 %407 }
 0x2e0   :  { %v409_v57 = vsub.f32 %v404_v54, %v408_v56 }
 0x2e2   :  { %v410_v58 = vmul.f32 1.442695, %v409_v57 }
 0x2e4   :  { %506 = vpow2.f32 %v410_v58 }
 0x2ee   :  { %v507_v59 = vpop.eup %506 }
 0x2ef   :  { %v412_v60 = vsel %vm405_vm6, %v507_v59, 0.0 }
 0x2f0   :  { %413 = vadd.xlane.f32.xlu1 %v412_v60 }
 0x37d   :  { %v414_v61 = vpop.xlane.xlu1 %413 }
 0x37e   :  { %508 = vrcp.f32 %v414_v61 }
 0x388   :  { %v509_v62 = vpop.eup %508 }
 0x389   :  { %v416_v63 = vmul.f32 %v509_v62, %v507_v59 }
 0x38b   :  { %417 = vst.msk [vmem:[#allocation5] sm:$0x1] %vm405_vm6, %v416_v63 }
 0x38c   :  { %533 = shalt.err (!%p530_p9)
}
 0x38d   :  { %s534_s7 = scalar_lea.hbm %s623_s3, 16 }
 0x38e   :  { %p535_p10 = scmp.ne.s32.totalorder %s623_s3, %s534_s7  ;;  %p538_p11 = scmp.lt.u32.totalorder %s534_s7, %s623_s3 }
 0x390   :  { %p540_p12 = pnand %p538_p11, %p535_p10 }
 0x392   :  { %543 = shalt.err (!%p540_p12)
}
 0x393   :  { %427 = dma.vmem_to_hbm [thread:$0]  %s425_s29, 16, %s623_s3, [#allocation3]  }
 0x394   :  { %546 = dma.done.wait [#allocation3], 16  }
 0x395   :  { %547 = vsyncadd [#allocation3], 4294967280 }
 0x396   :  { %431 = vsyncpa [#allocation3], 1 }
 0x397   :  { %432 = vsyncpa [#allocation4], 1 }

</bundles_post_ra>
